<compile_context>
chip_gen: v7x
topology: tpu7x:2x2x1
jax: 0.10.0
libtpu: 0.0.40
codegen_flags: <defaults>
</compile_context>

<pallas_src>
import jax
import jax.numpy as jnp
from jax import lax
from jax.experimental import pallas as pl
from jax.experimental.pallas import tpu as pltpu


def bilinear_matrix(out_size: int, in_size: int) -> jnp.ndarray:
    """1-D bilinear interpolation matrix (out_size, in_size), align_corners=False
    (PyTorch convention). Built in f32 so each row sums to exactly 1."""
    scale = in_size / out_size
    dst = jnp.arange(out_size, dtype=jnp.float32)
    src = (dst + 0.5) * scale - 0.5
    src = jnp.clip(src, 0.0, float(in_size - 1))
    i0 = jnp.floor(src).astype(jnp.int32)
    i1 = jnp.minimum(i0 + 1, in_size - 1)
    frac = src - i0.astype(jnp.float32)
    rows = jnp.arange(out_size)
    w = jnp.zeros((out_size, in_size), jnp.float32)
    w = w.at[rows, i0].add(1.0 - frac)
    w = w.at[rows, i1].add(frac)
    return w


def _resize_kernel(a_ref, bt_ref, x_ref, o_ref):
    # a_ref : (out_h, h_in)          compute-dtype H-resize weights
    # bt_ref: (w_in, out_wp)         compute-dtype W-resize weights (transposed, lane-padded)
    # x_ref : (tt, c, h_in, w_in)    input block  (leading b dim squeezed)
    # o_ref : (c, tt, out_h, out_wp) output block (leading b dim squeezed)
    tt, c, h_in, w_in = x_ref.shape
    out_wp = o_ref.shape[3]
    cdt = a_ref.dtype

    a = a_ref[...]
    bt = bt_ref[...]

    # W-resize: one big MXU matmul with c folded into the M dimension.
    # (Layout-free reshape when h_in % 8 == 0.)
    x = x_ref[...].astype(cdt).reshape(tt * c * h_in, w_in)
    tmp = jnp.dot(x, bt, preferred_element_type=jnp.float32)      # (tt*c*h_in, out_wp)
    tmp = tmp.astype(cdt).reshape(tt * c, h_in, out_wp)

    # H-resize: unrolled per-image dot, stored straight into the final
    # (b, c, t, H, Wp) layout (lane-dense, unmasked stores when out_wp % 128 == 0).
    for n in range(tt):
        for ci in range(c):
            img = jnp.dot(a, tmp[n * c + ci],
                          preferred_element_type=jnp.float32)     # (out_h, out_wp)
            o_ref[ci, n] = img.astype(o_ref.dtype)


def _vmem_capacity_bytes() -> int:
    try:
        return int(pltpu.get_tpu_info().vmem_capacity_bytes)
    except Exception:
        return 64 * 1024 * 1024   # conservative (v7x-sized) fallback


def _block_vmem_bytes(tt, c, h_in, w_in, out_h, out_wp,
                      in_itemsize, out_itemsize, compute_itemsize) -> int:
    in_tile = tt * c * h_in * w_in * in_itemsize
    out_tile = tt * c * out_h * out_wp * out_itemsize
    tiles = 2 * (in_tile + out_tile)                            # double-buffered pipeline tiles
    weights = 2 * (out_h * h_in + w_in * out_wp) * compute_itemsize
    work = (tt * c * h_in * w_in * compute_itemsize             # compute-dtype input copy
            + tt * c * h_in * out_wp * (4 + compute_itemsize)   # f32 + cdt W-resize intermediate
            + out_h * out_wp * 4)                               # per-image f32 result
    return tiles + weights + work


def _choose_tt(t, c, h_in, w_in, out_h, out_wp,
               in_itemsize, out_itemsize, compute_itemsize, budget_bytes) -> int:
    """Largest divisor of t whose per-step footprint fits the VMEM budget."""
    best = 1
    for tt in range(1, t + 1):
        if t % tt == 0 and _block_vmem_bytes(
                tt, c, h_in, w_in, out_h, out_wp,
                in_itemsize, out_itemsize, compute_itemsize) <= budget_bytes:
            best = tt
    return best


def pallas_simclr_resize(sample, out_h, out_w, tt=None):
    """sample: (b, t, c, h_in, w_in) -> (b, c, t, out_h, out_w) bilinear resize,
    with the '(b t) c h w -> b c t h w' transpose fused into the output index_map."""
    b, t, c, h_in, w_in = sample.shape
    compute_dtype = jnp.bfloat16 if sample.dtype == jnp.bfloat16 else jnp.float32

    # Lane-dense output: pad the W axis to a multiple of 128 (sliced off below),
    # unless the pad would more than double the output writeback (tiny outputs).
    out_wp = -(-out_w // 128) * 128
    if out_wp > 2 * out_w:
        out_wp = out_w

    cap = _vmem_capacity_bytes()
    vmem_limit = min((cap * 3) // 4, cap - 16 * 1024 * 1024)   # 48 MiB on v7x, 96 MiB on v5e/v6e
    block_budget = vmem_limit // 2

    in_isz = jnp.dtype(sample.dtype).itemsize
    c_isz = jnp.dtype(compute_dtype).itemsize
    if tt is None:
        tt = _choose_tt(t, c, h_in, w_in, out_h, out_wp,
                        in_isz, in_isz, c_isz, block_budget)
    assert t % tt == 0, (t, tt)

    # Make sure both v7x TensorCores get grid work when b == 1
    # (the extra grid step is negligible on v5e/v6e).
    if b * (t // tt) < 2 and t > 1:
        for cand in range(t // 2, 0, -1):
            if t % cand == 0:
                tt = cand
                break

    est = _block_vmem_bytes(tt, c, h_in, w_in, out_h, out_wp, in_isz, in_isz, c_isz)
    if est > vmem_limit:
        raise ValueError(
            f"Resize block (tt={tt}) needs ~{est >> 20} MiB VMEM, exceeding the "
            f"{vmem_limit >> 20} MiB limit on this TPU; shrink the images or tile H/W.")

    a = bilinear_matrix(out_h, h_in)                            # (out_h, h_in) f32
    bt = bilinear_matrix(out_w, w_in).T                         # (w_in, out_w) f32
    if out_wp != out_w:
        bt = jnp.zeros((w_in, out_wp), jnp.float32).at[:, :out_w].set(bt)
    a = a.astype(compute_dtype)
    bt = bt.astype(compute_dtype)

    y = pl.pallas_call(
        _resize_kernel,
        out_shape=jax.ShapeDtypeStruct((b, c, t, out_h, out_wp), sample.dtype),
        grid_spec=pltpu.PrefetchScalarGridSpec(
            num_scalar_prefetch=0,
            grid=(b, t // tt),
            in_specs=[
                pl.BlockSpec((out_h, h_in), lambda ib, jt: (0, 0)),
                pl.BlockSpec((w_in, out_wp), lambda ib, jt: (0, 0)),
                pl.BlockSpec((pl.Squeezed(), tt, c, h_in, w_in),
                             lambda ib, jt: (ib, jt, 0, 0, 0)),
            ],
            out_specs=pl.BlockSpec((pl.Squeezed(), c, tt, out_h, out_wp),
                                   lambda ib, jt: (ib, 0, jt, 0, 0)),
        ),
        compiler_params=pltpu.CompilerParams(
            dimension_semantics=("parallel", "parallel"),
            vmem_limit_bytes=int(vmem_limit),
        ),
    )(a, bt, sample)

    if out_wp != out_w:
        y = y[..., :out_w]
    return y


def simclr_eval_data_transform(sample, input_height, tt=None):
    """sample: (b, t, c, w, h) -> (x_i, x_j), each (b, c, t, input_height, input_height)."""
    y = pallas_simclr_resize(sample, input_height, input_height, tt=tt)
    # Eval transform is deterministic -> x_i == x_j (callers must not mutate in place).
    return y, y


if __name__ == "__main__":
    key = jax.random.PRNGKey(0)

    def resize_ref(x, oh, ow):
        bb, tt_, cc, hh, ww = x.shape
        A = bilinear_matrix(oh, hh)
        B = bilinear_matrix(ow, ww)
        r = jnp.einsum("oi,nij,pj->nop", A, x.reshape(bb * tt_ * cc, hh, ww), B,
                       precision=lax.Precision.HIGHEST)
        return r.reshape(bb, tt_, cc, oh, ow).transpose(0, 2, 1, 3, 4)

    # Check 1: base path (out=8, no lane padding; full t in one block).
    b, t, c, w, h = 2, 3, 4, 16, 16
    input_height = 8
    sample = jax.random.uniform(key, (b, t, c, w, h), dtype=jnp.float32)

    x_i, x_j = simclr_eval_data_transform(sample, input_height)
    jax.block_until_ready((x_i, x_j))

    assert x_i.shape == (b, c, t, input_height, input_height), x_i.shape
    assert x_j.shape == (b, c, t, input_height, input_height), x_j.shape
    assert x_i.dtype == sample.dtype

    ref = resize_ref(sample, input_height, input_height)
    assert jnp.allclose(x_i, ref, atol=1e-4, rtol=1e-4)
    assert jnp.allclose(x_j, ref, atol=1e-4, rtol=1e-4)

    # Check 2: exercises t-tiling (tt < t) and the fused layout transpose.
    b2, t2, c2 = 2, 4, 3
    sample2 = jax.random.uniform(jax.random.PRNGKey(1), (b2, t2, c2, w, h),
                                 dtype=jnp.float32)
    y2, _ = simclr_eval_data_transform(sample2, input_height, tt=2)
    jax.block_until_ready(y2)
    assert jnp.allclose(y2, resize_ref(sample2, input_height, input_height),
                        atol=1e-4, rtol=1e-4)

    # Check 3: lane-padded output (96 -> 128) and the b == 1 two-core t split.
    b3, t3, c3 = 1, 2, 3
    oh3 = 96
    sample3 = jax.random.uniform(jax.random.PRNGKey(2), (b3, t3, c3, w, h),
                                 dtype=jnp.float32)
    y3, _ = simclr_eval_data_transform(sample3, oh3)
    jax.block_until_ready(y3)
    assert y3.shape == (b3, c3, t3, oh3, oh3), y3.shape
    assert jnp.allclose(y3, resize_ref(sample3, oh3, oh3), atol=1e-4, rtol=1e-4)

    print("KERNEL_OK")
</pallas_src>

<mosaic_0001>
module attributes {stable_mosaic.version = 11 : i64} {
  func.func @_resize_kernel(%arg0: i32, %arg1: i32, %arg2: memref<8x16xf32, #tpu.memory_space<vmem>>, %arg3: memref<16x8xf32, #tpu.memory_space<vmem>>, %arg4: memref<1x3x4x16x16xf32, #tpu.memory_space<vmem>>, %arg5: memref<1x4x3x8x8xf32, #tpu.memory_space<vmem>>) attributes {dimension_semantics = [#tpu.dimension_semantics<parallel>, #tpu.dimension_semantics<parallel>], iteration_bounds = array<i64: 2, 1>, scalar_prefetch = 0 : i64, scratch_operands = 0 : i64, tpu.core_type = #tpu.core_type<tc>, window_params = [{pipeline_mode = #tpu.pipeline_mode<synchronous>, transform_indices = @transform_0, window_bounds = array<i64: 8, 16>}, {pipeline_mode = #tpu.pipeline_mode<synchronous>, transform_indices = @transform_1, window_bounds = array<i64: 16, 8>}, {transform_indices = @transform_2, window_bounds = array<i64: 1, 3, 4, 16, 16>}, {transform_indices = @transform_3, window_bounds = array<i64: 1, 4, 3, 8, 8>}]} {
    %c0 = arith.constant 0 : index
    %c0_0 = arith.constant 0 : index
    %0 = vector.load %arg2[%c0, %c0_0] : memref<8x16xf32, #tpu.memory_space<vmem>>, vector<8x16xf32>
    %c0_1 = arith.constant 0 : index
    %c0_2 = arith.constant 0 : index
    %1 = vector.load %arg3[%c0_1, %c0_2] : memref<16x8xf32, #tpu.memory_space<vmem>>, vector<16x8xf32>
    %c0_3 = arith.constant 0 : index
    %c0_4 = arith.constant 0 : index
    %c0_5 = arith.constant 0 : index
    %c0_6 = arith.constant 0 : index
    %c0_7 = arith.constant 0 : index
    %2 = vector.load %arg4[%c0_3, %c0_4, %c0_5, %c0_6, %c0_7] : memref<1x3x4x16x16xf32, #tpu.memory_space<vmem>>, vector<1x3x4x16x16xf32>
    %3 = vector.shape_cast %2 : vector<1x3x4x16x16xf32> to vector<3x4x16x16xf32>
    %4 = vector.shape_cast %3 : vector<3x4x16x16xf32> to vector<192x16xf32>
    %cst = arith.constant dense<0.000000e+00> : vector<192x8xf32>
    %5 = tpu.matmul %4, %1, %cst {dimension_numbers = #tpu.dot_dimension_numbers<[1], [0], [0], [1], [0, 0, 1, 1], [], []>} : vector<192x16xf32>, vector<16x8xf32>, vector<192x8xf32> -> vector<192x8xf32>
    %6 = vector.shape_cast %5 : vector<192x8xf32> to vector<12x16x8xf32>
    %7 = vector.extract_strided_slice %6 {offsets = [0, 0, 0], sizes = [1, 16, 8], strides = [1, 1, 1]} : vector<12x16x8xf32> to vector<1x16x8xf32>
    %8 = vector.shape_cast %7 : vector<1x16x8xf32> to vector<16x8xf32>
    %cst_8 = arith.constant dense<0.000000e+00> : vector<8x8xf32>
    %9 = tpu.matmul %0, %8, %cst_8 {dimension_numbers = #tpu.dot_dimension_numbers<[1], [0], [0], [1], [0, 0, 1, 1], [], []>} : vector<8x16xf32>, vector<16x8xf32>, vector<8x8xf32> -> vector<8x8xf32>
    %c0_9 = arith.constant 0 : index
    %c0_10 = arith.constant 0 : index
    %c0_11 = arith.constant 0 : index
    %c0_12 = arith.constant 0 : index
    %c0_13 = arith.constant 0 : index
    %10 = vector.load %arg5[%c0_9, %c0_10, %c0_11, %c0_12, %c0_13] : memref<1x4x3x8x8xf32, #tpu.memory_space<vmem>>, vector<1x1x1x8x8xf32>
    %11 = vector.shape_cast %10 : vector<1x1x1x8x8xf32> to vector<8x8xf32>
    %12 = vector.shape_cast %9 : vector<8x8xf32> to vector<1x1x1x8x8xf32>
    tpu.vector_store %arg5[%c0_9, %c0_10, %c0_11, %c0_12, %c0_13], %12 {strides = array<i32>} : memref<1x4x3x8x8xf32, #tpu.memory_space<vmem>>, vector<1x1x1x8x8xf32>,
    %13 = vector.extract_strided_slice %6 {offsets = [1, 0, 0], sizes = [1, 16, 8], strides = [1, 1, 1]} : vector<12x16x8xf32> to vector<1x16x8xf32>
    %14 = vector.shape_cast %13 : vector<1x16x8xf32> to vector<16x8xf32>
    %cst_14 = arith.constant dense<0.000000e+00> : vector<8x8xf32>
    %15 = tpu.matmul %0, %14, %cst_14 {dimension_numbers = #tpu.dot_dimension_numbers<[1], [0], [0], [1], [0, 0, 1, 1], [], []>} : vector<8x16xf32>, vector<16x8xf32>, vector<8x8xf32> -> vector<8x8xf32>
    %c0_15 = arith.constant 0 : index
    %c1 = arith.constant 1 : index
    %c0_16 = arith.constant 0 : index
    %c0_17 = arith.constant 0 : index
    %c0_18 = arith.constant 0 : index
    %16 = vector.load %arg5[%c0_15, %c1, %c0_16, %c0_17, %c0_18] : memref<1x4x3x8x8xf32, #tpu.memory_space<vmem>>, vector<1x1x1x8x8xf32>
    %17 = vector.shape_cast %16 : vector<1x1x1x8x8xf32> to vector<8x8xf32>
    %18 = vector.shape_cast %15 : vector<8x8xf32> to vector<1x1x1x8x8xf32>
    tpu.vector_store %arg5[%c0_15, %c1, %c0_16, %c0_17, %c0_18], %18 {strides = array<i32>} : memref<1x4x3x8x8xf32, #tpu.memory_space<vmem>>, vector<1x1x1x8x8xf32>,
    %19 = vector.extract_strided_slice %6 {offsets = [2, 0, 0], sizes = [1, 16, 8], strides = [1, 1, 1]} : vector<12x16x8xf32> to vector<1x16x8xf32>
    %20 = vector.shape_cast %19 : vector<1x16x8xf32> to vector<16x8xf32>
    %cst_19 = arith.constant dense<0.000000e+00> : vector<8x8xf32>
    %21 = tpu.matmul %0, %20, %cst_19 {dimension_numbers = #tpu.dot_dimension_numbers<[1], [0], [0], [1], [0, 0, 1, 1], [], []>} : vector<8x16xf32>, vector<16x8xf32>, vector<8x8xf32> -> vector<8x8xf32>
    %c0_20 = arith.constant 0 : index
    %c2 = arith.constant 2 : index
    %c0_21 = arith.constant 0 : index
    %c0_22 = arith.constant 0 : index
    %c0_23 = arith.constant 0 : index
    %22 = vector.load %arg5[%c0_20, %c2, %c0_21, %c0_22, %c0_23] : memref<1x4x3x8x8xf32, #tpu.memory_space<vmem>>, vector<1x1x1x8x8xf32>
    %23 = vector.shape_cast %22 : vector<1x1x1x8x8xf32> to vector<8x8xf32>
    %24 = vector.shape_cast %21 : vector<8x8xf32> to vector<1x1x1x8x8xf32>
    tpu.vector_store %arg5[%c0_20, %c2, %c0_21, %c0_22, %c0_23], %24 {strides = array<i32>} : memref<1x4x3x8x8xf32, #tpu.memory_space<vmem>>, vector<1x1x1x8x8xf32>,
    %25 = vector.extract_strided_slice %6 {offsets = [3, 0, 0], sizes = [1, 16, 8], strides = [1, 1, 1]} : vector<12x16x8xf32> to vector<1x16x8xf32>
    %26 = vector.shape_cast %25 : vector<1x16x8xf32> to vector<16x8xf32>
    %cst_24 = arith.constant dense<0.000000e+00> : vector<8x8xf32>
    %27 = tpu.matmul %0, %26, %cst_24 {dimension_numbers = #tpu.dot_dimension_numbers<[1], [0], [0], [1], [0, 0, 1, 1], [], []>} : vector<8x16xf32>, vector<16x8xf32>, vector<8x8xf32> -> vector<8x8xf32>
    %c0_25 = arith.constant 0 : index
    %c3 = arith.constant 3 : index
    %c0_26 = arith.constant 0 : index
    %c0_27 = arith.constant 0 : index
    %c0_28 = arith.constant 0 : index
    %28 = vector.load %arg5[%c0_25, %c3, %c0_26, %c0_27, %c0_28] : memref<1x4x3x8x8xf32, #tpu.memory_space<vmem>>, vector<1x1x1x8x8xf32>
    %29 = vector.shape_cast %28 : vector<1x1x1x8x8xf32> to vector<8x8xf32>
    %30 = vector.shape_cast %27 : vector<8x8xf32> to vector<1x1x1x8x8xf32>
    tpu.vector_store %arg5[%c0_25, %c3, %c0_26, %c0_27, %c0_28], %30 {strides = array<i32>} : memref<1x4x3x8x8xf32, #tpu.memory_space<vmem>>, vector<1x1x1x8x8xf32>,
    %31 = vector.extract_strided_slice %6 {offsets = [4, 0, 0], sizes = [1, 16, 8], strides = [1, 1, 1]} : vector<12x16x8xf32> to vector<1x16x8xf32>
    %32 = vector.shape_cast %31 : vector<1x16x8xf32> to vector<16x8xf32>
    %cst_29 = arith.constant dense<0.000000e+00> : vector<8x8xf32>
    %33 = tpu.matmul %0, %32, %cst_29 {dimension_numbers = #tpu.dot_dimension_numbers<[1], [0], [0], [1], [0, 0, 1, 1], [], []>} : vector<8x16xf32>, vector<16x8xf32>, vector<8x8xf32> -> vector<8x8xf32>
    %c0_30 = arith.constant 0 : index
    %c0_31 = arith.constant 0 : index
    %c1_32 = arith.constant 1 : index
    %c0_33 = arith.constant 0 : index
    %c0_34 = arith.constant 0 : index
    %34 = vector.load %arg5[%c0_30, %c0_31, %c1_32, %c0_33, %c0_34] : memref<1x4x3x8x8xf32, #tpu.memory_space<vmem>>, vector<1x1x1x8x8xf32>
    %35 = vector.shape_cast %34 : vector<1x1x1x8x8xf32> to vector<8x8xf32>
    %36 = vector.shape_cast %33 : vector<8x8xf32> to vector<1x1x1x8x8xf32>
    tpu.vector_store %arg5[%c0_30, %c0_31, %c1_32, %c0_33, %c0_34], %36 {strides = array<i32>} : memref<1x4x3x8x8xf32, #tpu.memory_space<vmem>>, vector<1x1x1x8x8xf32>,
    %37 = vector.extract_strided_slice %6 {offsets = [5, 0, 0], sizes = [1, 16, 8], strides = [1, 1, 1]} : vector<12x16x8xf32> to vector<1x16x8xf32>
    %38 = vector.shape_cast %37 : vector<1x16x8xf32> to vector<16x8xf32>
    %cst_35 = arith.constant dense<0.000000e+00> : vector<8x8xf32>
    %39 = tpu.matmul %0, %38, %cst_35 {dimension_numbers = #tpu.dot_dimension_numbers<[1], [0], [0], [1], [0, 0, 1, 1], [], []>} : vector<8x16xf32>, vector<16x8xf32>, vector<8x8xf32> -> vector<8x8xf32>
    %c0_36 = arith.constant 0 : index
    %c1_37 = arith.constant 1 : index
    %c1_38 = arith.constant 1 : index
    %c0_39 = arith.constant 0 : index
    %c0_40 = arith.constant 0 : index
    %40 = vector.load %arg5[%c0_36, %c1_37, %c1_38, %c0_39, %c0_40] : memref<1x4x3x8x8xf32, #tpu.memory_space<vmem>>, vector<1x1x1x8x8xf32>
    %41 = vector.shape_cast %40 : vector<1x1x1x8x8xf32> to vector<8x8xf32>
    %42 = vector.shape_cast %39 : vector<8x8xf32> to vector<1x1x1x8x8xf32>
    tpu.vector_store %arg5[%c0_36, %c1_37, %c1_38, %c0_39, %c0_40], %42 {strides = array<i32>} : memref<1x4x3x8x8xf32, #tpu.memory_space<vmem>>, vector<1x1x1x8x8xf32>,
    %43 = vector.extract_strided_slice %6 {offsets = [6, 0, 0], sizes = [1, 16, 8], strides = [1, 1, 1]} : vector<12x16x8xf32> to vector<1x16x8xf32>
    %44 = vector.shape_cast %43 : vector<1x16x8xf32> to vector<16x8xf32>
    %cst_41 = arith.constant dense<0.000000e+00> : vector<8x8xf32>
    %45 = tpu.matmul %0, %44, %cst_41 {dimension_numbers = #tpu.dot_dimension_numbers<[1], [0], [0], [1], [0, 0, 1, 1], [], []>} : vector<8x16xf32>, vector<16x8xf32>, vector<8x8xf32> -> vector<8x8xf32>
    %c0_42 = arith.constant 0 : index
    %c2_43 = arith.constant 2 : index
    %c1_44 = arith.constant 1 : index
    %c0_45 = arith.constant 0 : index
    %c0_46 = arith.constant 0 : index
    %46 = vector.load %arg5[%c0_42, %c2_43, %c1_44, %c0_45, %c0_46] : memref<1x4x3x8x8xf32, #tpu.memory_space<vmem>>, vector<1x1x1x8x8xf32>
    %47 = vector.shape_cast %46 : vector<1x1x1x8x8xf32> to vector<8x8xf32>
    %48 = vector.shape_cast %45 : vector<8x8xf32> to vector<1x1x1x8x8xf32>
    tpu.vector_store %arg5[%c0_42, %c2_43, %c1_44, %c0_45, %c0_46], %48 {strides = array<i32>} : memref<1x4x3x8x8xf32, #tpu.memory_space<vmem>>, vector<1x1x1x8x8xf32>,
    %49 = vector.extract_strided_slice %6 {offsets = [7, 0, 0], sizes = [1, 16, 8], strides = [1, 1, 1]} : vector<12x16x8xf32> to vector<1x16x8xf32>
    %50 = vector.shape_cast %49 : vector<1x16x8xf32> to vector<16x8xf32>
    %cst_47 = arith.constant dense<0.000000e+00> : vector<8x8xf32>
    %51 = tpu.matmul %0, %50, %cst_47 {dimension_numbers = #tpu.dot_dimension_numbers<[1], [0], [0], [1], [0, 0, 1, 1], [], []>} : vector<8x16xf32>, vector<16x8xf32>, vector<8x8xf32> -> vector<8x8xf32>
    %c0_48 = arith.constant 0 : index
    %c3_49 = arith.constant 3 : index
    %c1_50 = arith.constant 1 : index
    %c0_51 = arith.constant 0 : index
    %c0_52 = arith.constant 0 : index
    %52 = vector.load %arg5[%c0_48, %c3_49, %c1_50, %c0_51, %c0_52] : memref<1x4x3x8x8xf32, #tpu.memory_space<vmem>>, vector<1x1x1x8x8xf32>
    %53 = vector.shape_cast %52 : vector<1x1x1x8x8xf32> to vector<8x8xf32>
    %54 = vector.shape_cast %51 : vector<8x8xf32> to vector<1x1x1x8x8xf32>
    tpu.vector_store %arg5[%c0_48, %c3_49, %c1_50, %c0_51, %c0_52], %54 {strides = array<i32>} : memref<1x4x3x8x8xf32, #tpu.memory_space<vmem>>, vector<1x1x1x8x8xf32>,
    %55 = vector.extract_strided_slice %6 {offsets = [8, 0, 0], sizes = [1, 16, 8], strides = [1, 1, 1]} : vector<12x16x8xf32> to vector<1x16x8xf32>
    %56 = vector.shape_cast %55 : vector<1x16x8xf32> to vector<16x8xf32>
    %cst_53 = arith.constant dense<0.000000e+00> : vector<8x8xf32>
    %57 = tpu.matmul %0, %56, %cst_53 {dimension_numbers = #tpu.dot_dimension_numbers<[1], [0], [0], [1], [0, 0, 1, 1], [], []>} : vector<8x16xf32>, vector<16x8xf32>, vector<8x8xf32> -> vector<8x8xf32>
    %c0_54 = arith.constant 0 : index
    %c0_55 = arith.constant 0 : index
    %c2_56 = arith.constant 2 : index
    %c0_57 = arith.constant 0 : index
    %c0_58 = arith.constant 0 : index
    %58 = vector.load %arg5[%c0_54, %c0_55, %c2_56, %c0_57, %c0_58] : memref<1x4x3x8x8xf32, #tpu.memory_space<vmem>>, vector<1x1x1x8x8xf32>
    %59 = vector.shape_cast %58 : vector<1x1x1x8x8xf32> to vector<8x8xf32>
    %60 = vector.shape_cast %57 : vector<8x8xf32> to vector<1x1x1x8x8xf32>
    tpu.vector_store %arg5[%c0_54, %c0_55, %c2_56, %c0_57, %c0_58], %60 {strides = array<i32>} : memref<1x4x3x8x8xf32, #tpu.memory_space<vmem>>, vector<1x1x1x8x8xf32>,
    %61 = vector.extract_strided_slice %6 {offsets = [9, 0, 0], sizes = [1, 16, 8], strides = [1, 1, 1]} : vector<12x16x8xf32> to vector<1x16x8xf32>
    %62 = vector.shape_cast %61 : vector<1x16x8xf32> to vector<16x8xf32>
    %cst_59 = arith.constant dense<0.000000e+00> : vector<8x8xf32>
    %63 = tpu.matmul %0, %62, %cst_59 {dimension_numbers = #tpu.dot_dimension_numbers<[1], [0], [0], [1], [0, 0, 1, 1], [], []>} : vector<8x16xf32>, vector<16x8xf32>, vector<8x8xf32> -> vector<8x8xf32>
    %c0_60 = arith.constant 0 : index
    %c1_61 = arith.constant 1 : index
    %c2_62 = arith.constant 2 : index
    %c0_63 = arith.constant 0 : index
    %c0_64 = arith.constant 0 : index
    %64 = vector.load %arg5[%c0_60, %c1_61, %c2_62, %c0_63, %c0_64] : memref<1x4x3x8x8xf32, #tpu.memory_space<vmem>>, vector<1x1x1x8x8xf32>
    %65 = vector.shape_cast %64 : vector<1x1x1x8x8xf32> to vector<8x8xf32>
    %66 = vector.shape_cast %63 : vector<8x8xf32> to vector<1x1x1x8x8xf32>
    tpu.vector_store %arg5[%c0_60, %c1_61, %c2_62, %c0_63, %c0_64], %66 {strides = array<i32>} : memref<1x4x3x8x8xf32, #tpu.memory_space<vmem>>, vector<1x1x1x8x8xf32>,
    %67 = vector.extract_strided_slice %6 {offsets = [10, 0, 0], sizes = [1, 16, 8], strides = [1, 1, 1]} : vector<12x16x8xf32> to vector<1x16x8xf32>
    %68 = vector.shape_cast %67 : vector<1x16x8xf32> to vector<16x8xf32>
    %cst_65 = arith.constant dense<0.000000e+00> : vector<8x8xf32>
    %69 = tpu.matmul %0, %68, %cst_65 {dimension_numbers = #tpu.dot_dimension_numbers<[1], [0], [0], [1], [0, 0, 1, 1], [], []>} : vector<8x16xf32>, vector<16x8xf32>, vector<8x8xf32> -> vector<8x8xf32>
    %c0_66 = arith.constant 0 : index
    %c2_67 = arith.constant 2 : index
    %c2_68 = arith.constant 2 : index
    %c0_69 = arith.constant 0 : index
    %c0_70 = arith.constant 0 : index
    %70 = vector.load %arg5[%c0_66, %c2_67, %c2_68, %c0_69, %c0_70] : memref<1x4x3x8x8xf32, #tpu.memory_space<vmem>>, vector<1x1x1x8x8xf32>
    %71 = vector.shape_cast %70 : vector<1x1x1x8x8xf32> to vector<8x8xf32>
    %72 = vector.shape_cast %69 : vector<8x8xf32> to vector<1x1x1x8x8xf32>
    tpu.vector_store %arg5[%c0_66, %c2_67, %c2_68, %c0_69, %c0_70], %72 {strides = array<i32>} : memref<1x4x3x8x8xf32, #tpu.memory_space<vmem>>, vector<1x1x1x8x8xf32>,
    %73 = vector.extract_strided_slice %6 {offsets = [11, 0, 0], sizes = [1, 16, 8], strides = [1, 1, 1]} : vector<12x16x8xf32> to vector<1x16x8xf32>
    %74 = vector.shape_cast %73 : vector<1x16x8xf32> to vector<16x8xf32>
    %cst_71 = arith.constant dense<0.000000e+00> : vector<8x8xf32>
    %75 = tpu.matmul %0, %74, %cst_71 {dimension_numbers = #tpu.dot_dimension_numbers<[1], [0], [0], [1], [0, 0, 1, 1], [], []>} : vector<8x16xf32>, vector<16x8xf32>, vector<8x8xf32> -> vector<8x8xf32>
    %c0_72 = arith.constant 0 : index
    %c3_73 = arith.constant 3 : index
    %c2_74 = arith.constant 2 : index
    %c0_75 = arith.constant 0 : index
    %c0_76 = arith.constant 0 : index
    %76 = vector.load %arg5[%c0_72, %c3_73, %c2_74, %c0_75, %c0_76] : memref<1x4x3x8x8xf32, #tpu.memory_space<vmem>>, vector<1x1x1x8x8xf32>
    %77 = vector.shape_cast %76 : vector<1x1x1x8x8xf32> to vector<8x8xf32>
    %78 = vector.shape_cast %75 : vector<8x8xf32> to vector<1x1x1x8x8xf32>
    tpu.vector_store %arg5[%c0_72, %c3_73, %c2_74, %c0_75, %c0_76], %78 {strides = array<i32>} : memref<1x4x3x8x8xf32, #tpu.memory_space<vmem>>, vector<1x1x1x8x8xf32>,
    return
  }
  func.func @transform_0(%arg0: i32, %arg1: i32) -> (i32, i32) {
    %c0_i32 = arith.constant 0 : i32
    %c0_i32_0 = arith.constant 0 : i32
    %c0_i32_1 = arith.constant 0 : i32
    return %c0_i32, %c0_i32_0 : i32, i32
  }
  func.func @transform_1(%arg0: i32, %arg1: i32) -> (i32, i32) {
    %c0_i32 = arith.constant 0 : i32
    %c0_i32_0 = arith.constant 0 : i32
    %c0_i32_1 = arith.constant 0 : i32
    return %c0_i32, %c0_i32_0 : i32, i32
  }
  func.func @transform_2(%arg0: i32, %arg1: i32) -> (i32, i32, i32, i32, i32) {
    %c0_i32 = arith.constant 0 : i32
    %c0_i32_0 = arith.constant 0 : i32
    %c0_i32_1 = arith.constant 0 : i32
    %c0_i32_2 = arith.constant 0 : i32
    return %arg0, %arg1, %c0_i32, %c0_i32_0, %c0_i32_1 : i32, i32, i32, i32, i32
  }
  func.func @transform_3(%arg0: i32, %arg1: i32) -> (i32, i32, i32, i32, i32) {
    %c0_i32 = arith.constant 0 : i32
    %c0_i32_0 = arith.constant 0 : i32
    %c0_i32_1 = arith.constant 0 : i32
    %c0_i32_2 = arith.constant 0 : i32
    return %arg0, %c0_i32, %arg1, %c0_i32_0, %c0_i32_1 : i32, i32, i32, i32, i32
  }
}

</mosaic_0001>

<bundles_post_ra>
// kernel: tpu_custom_call.1
= control target key start
LH: loop header
LB: loop body
LE: loop exit
PB: predicated region body
PF: predicated region fallthrough
CT: control target
= control target key end

     0   :  { %8 = vsyncpa [#allocation3], 0  ;;  %s2288_s0 = inlined_call_operand.vmem [shape: f32[8,16], index: 0, kind: input, shape index: {}]   ;;  %s2289_s1 = inlined_call_operand.vmem [shape: f32[16,8], index: 1, kind: input, shape index: {}]   ;;  %s2290_s2 = inlined_call_operand.hbm [shape: f32[2,3,4,16,16], index: 2, kind: input, shape index: {}]   ;;  %s2291_s3 = inlined_call_operand.hbm [shape: f32[2,4,3,8,8], index: 3, kind: output, shape index: {}]  }
   0x1   :  { %10 = vsyncpa [#allocation3 + $0x1], 0 }
   0x2   :  { %11 = vsyncpa [#allocation4], 0 }
   0x3   :  { %13 = vsyncpa [#allocation4 + $0x1], 0  ;;  %s1964_s12 = smov 0   ;;  %s1966_s13 = smov 0  }
   0x4   :  { %s1968_s14 = smov 0   ;;  %s1970_s15 = smov 0  }
   0x5   :  { %s1972_s16 = smov 0   ;;  %s1974_s17 = smov 0  }
   0x6 LB: > { %s1465_s18 = sadd.s32 4294967295, %s1933_s17   ;;  %s1466_s19 = sadd.s32 4294967294, %s1933_s17   ;;  %s1933_s17 = sphi %s1974_s17, %s19_s17   ;;  %s1929_s16 = sphi %s1972_s16, %s2306_s16   ;;  %s1925_s15 = sphi %s1970_s15, %s2305_s15   ;;  %s1921_s14 = sphi %s1968_s14, %s2304_s14   ;;  %s1917_s13 = sphi %s1966_s13, %s2303_s13   ;;  %s1913_s12 = sphi %s1964_s12, %s2302_s12  }
   0x7   : > { %s31_s20 = sadd.s32 1, %s1929_s16  ;;  %s82_s21 = sadd.s32 1, %s1921_s14 }
   0x8   : > { %p33_p0 = scmp.ge.s32.totalorder %s31_s20, 2  ;;  %p89_p1 = scmp.ne.s32.totalorder %s1921_s14, %s1917_s13 }
   0x9   : > { %p90_p2 = scmp.eq.s32.totalorder %s1933_s17, 0  ;;  %p95_p3 = scmp.ne.s32.totalorder %s1917_s13, %s1913_s12 }
   0xa   : > { %s2308_s20 = smov (%p33_p0, %s31_s20), 0  ;;  %p96_p5 = scmp.eq.s32.totalorder %s1465_s18, 0 }
   0xb   : > { %p2005_p4 = por %p90_p2, %p89_p1  ;;  %s77_s23 = ssub.s32 %s1929_s16, %s2308_s20 }
   0xc   : > { %p121_p6 = scmp.eq.s32.totalorder %s1465_s18, 1  ;;  %p80_p7 = scmp.eq.s32.totalorder %s77_s23, 0 }
   0xd   : > { %p2011_p8 = por %p96_p5, %p95_p3  ;;  %p127_p10 = scmp.eq.s32.totalorder %s1466_s19, 1 }
   0xe   : > { %p2015_p9 = por %p121_p6, %p89_p1  ;;  %p1764_p13 = scmp.lt.s32.totalorder %s1933_s17, 2 }
   0xf   : > { %s2020_s26 = scalar_select %p80_p7, %s1921_s14, %s82_s21  }
  0x10   : > { %s2295_s25 = scalar_select %p2015_p9, 1, 0 }
  0x11   : > { %p2022_p11 = por %p127_p10, %p95_p3  ;;  %s153_s28 = sand.u32 1, %s1921_s14  }
  0x12   : > { %s1747_s29 = smul.u32 192, %s153_s28  ;;  %p2032_p0 = pnand %p1764_p13, %p2005_p4 }
  0x13   : > { %s2296_s27 = scalar_select %p2022_p11, 1, 0 }
  0x14   : > { %s1748_s30 = smul.u32 3072, %s1929_s16  ;;  %s157_s8 = scalar_lea.vmem [#allocation2], %s1747_s29 }
  0x15   : > { %s167_s9 = sshll.u32 %s157_s8, 4  ;;  %s2044_s10 = scalar_lea.sflag [#allocation3], %s153_s28  ;;  %s2041_s9 = int_to_ptr.vmem [resolvable:$true] %s167_s9 }
  0x16   : > { %s2039_s7 = scalar_lea.hbm %s2290_s2, %s1748_s30  ;;  %p1823_p3 = pneg %p2032_p0 }
  0x17   : > { %s1821_s11 = scalar_lea.hbm %s2039_s7, 3072  ;;  %s1826_s21 = scalar_lea.hbm %s2290_s2, 6144 }
  0x18   : > { %p1822_p2 = scmp.ne.s32.totalorder %s2039_s7, %s1821_s11  ;;  %p1827_p6 = scmp.lt.u32.totalorder %s2039_s7, %s2290_s2 }
  0x19   : > { %p1828_p7 = scmp.lt.u32.totalorder %s1826_s21, %s1821_s11  ;;  %p1830_p13 = scmp.lt.u32.totalorder %s1821_s11, %s2039_s7 }
  0x1a   : > { %p1824_p4 = pnand %p1823_p3, %p1822_p2 }
  0x1b   : > { %p1829_p10 = por %p1828_p7, %p1827_p6 }
  0x1c   : > { %p1825_p5 = pneg %p1824_p4 }
  0x1d   : > { %p1831_p12 = por %p1830_p13, %p1829_p10 }
  0x1f   : > { %p1832_p1 = pnand %p1831_p12, %p1825_p5 }
  0x21   : > { %1835 = shalt.err (!%p1832_p1)
}
  0x22   : > { %s1836_s28 = scalar_lea.vmem %s2041_s9, 3072  ;;  %s1935_s29 = smov [#allocation2]  }
  0x23   : > { %p1837_p2 = scmp.ne.s32.totalorder %s2041_s9, %s1836_s28  ;;  %s1841_s30 = sshll.u32 %s1935_s29, 4  ;;  %s1842_s30 = int_to_ptr.vmem [resolvable:$false] %s1841_s30 }
  0x24   : > { %s1843_s5 = scalar_lea.vmem %s1842_s30, 6144  ;;  %p1844_p9 = scmp.lt.s32.totalorder %s2041_s9, %s1842_s30 }
  0x25   : > { %p1839_p4 = pnand %p1837_p2, %p1823_p3  ;;  %p1845_p6 = scmp.lt.s32.totalorder %s1843_s5, %s1836_s28 }
  0x27   : > { %p1840_p11 = pneg %p1839_p4  ;;  %p1846_p7 = por %p1845_p6, %p1844_p9 }
  0x29   : > { %p1847_p10 = pnand %p1846_p7, %p1840_p11 }
  0x2b   : > { %1850 = shalt.err (!%p1847_p10)
}
  0x2c   : > { %s1936_s6 = smov 128   ;;  %s1937_s8 = smov 8  }
  0x2d   : > { %1759 = dma.hbm_to_vmem [thread:$0]  (!%p2032_p0), %s2039_s7, 3072, %s2041_s9, %s2044_s10, %s1936_s6, %s1936_s6, %s1937_s8  }
  0x2e   : > { %p175_p12 = scmp.lt.s32.totalorder %s1933_s17, 3  ;;  %p2298_p1 = scmp.ge.s32.totalorder %s1933_s17, 1 }
  0x30   : > { %p176_p3 = pnand %p2298_p1, %p175_p12 }
  0x31   : > { %s2076_s11 = sand.u32 (!%p176_p3), 1, %s1917_s13  }
  0x32   : > { %179 = sbr.rel (%p176_p3) target bundleno = 554 (0x22a), region = 32  ;;  %s182_s19 = scalar_lea.sflag (!%p176_p3), [#allocation3], %s2076_s11 }
  0x33   : > { %s1749_s18 = smul.u32 (!%p176_p3), 192, %s2076_s11 }
  0x35   : > { %s2080_s21 = scalar_lea.vmem (!%p176_p3), [#allocation2], %s1749_s18 }
  0x39   : > { %1904 = dma.done.wait (%p2011_p8), %s182_s19, 3072  }
  0x3a   : > { %1906 = vsyncadd (%p2011_p8), %s182_s19, 4294964224  ;;  %vm237_vm0 = vcmask 130048   ;;  %v211_v0 = vld [vmem:[%s2289_s1] sm:$0xff]  ;;  %v212_v1 = vld [vmem:[%s2289_s1 + $0x8] sm:$0xff]  ;;  %v1938_v27 = vmov 0.0|0.0   ;;  %vm1939_vm1 = vmmov 0  }
  0x3b   : > { %v213_v2 = vld [vmem:[%s2080_s21] sm:$0xff]  ;;  %v1707_v3 = vpack.c.bf16 %v212_v1, %v211_v0  ;;  %v214_v4 = vld [vmem:[%s2080_s21 + $0x8] sm:$0xff]  ;;  %v215_v5 = vld [vmem:[%s2080_s21 + $0x10] sm:$0xff]  ;;  %1711 = vmatprep.subr.bf16.mxu1 %v1938_v27  ;;  %v1940_v28 = vmov 0.0   ;;  %s1750_s23 = smul.u32 96, %s2076_s11  ;;  %vm568_vm2 = vcmask 64512  }
  0x3c   : > { %1587 = vmatprep.mubr.msk.f32.mxu0 %vm237_vm0, %v213_v2  ;;  %v216_v6 = vld [vmem:[%s2080_s21 + $0x18] sm:$0xff]  ;;  %v217_v7 = vld [vmem:[%s2080_s21 + $0x20] sm:$0xff]  ;;  %v218_v8 = vld [vmem:[%s2080_s21 + $0x28] sm:$0xff]  ;;  %1627 = vmatprep.mubr.msk.f32.mxu1 %vm1939_vm1, %v1940_v28  ;;  %s1751_s29 = smul.u32 1536, %s1925_s15  ;;  %s1363_s15 = scalar_lea.sflag [#allocation4], %s2076_s11 }
  0x3d   : > { %1708 = vmatprep.subr.bf16.mxu0 %v1707_v3  ;;  %v219_v9 = vld [vmem:[%s2080_s21 + $0x30] sm:$0xff]  ;;  %v220_v10 = vld [vmem:[%s2080_s21 + $0x38] sm:$0xff]  ;;  %v221_v11 = vld [vmem:[%s2080_s21 + $0x40] sm:$0xff]  ;;  %s2206_s28 = scalar_lea.vmem [#allocation5], %s1750_s23  ;;  %p2299_p9 = scmp.ne.s32.totalorder %s2295_s25, 0 }
  0x3e   : > { %1710 = vmatpush3.bf16.msra.mxu0 %v1707_v3  ;;  %v222_v12 = vld [vmem:[%s2080_s21 + $0x48] sm:$0xff]  ;;  %v223_v13 = vld [vmem:[%s2080_s21 + $0x50] sm:$0xff]  ;;  %v224_v14 = vld [vmem:[%s2080_s21 + $0x58] sm:$0xff]  ;;  %s1378_s30 = sshll.u32 %s2206_s28, 4  ;;  %s2235_s8 = scalar_lea.hbm %s2291_s3, %s1751_s29  ;;  %s2237_s30 = int_to_ptr.vmem [resolvable:$true] %s1378_s30 }
  0x3f   : > { %v225_v15 = vld [vmem:[%s2080_s21 + $0x60] sm:$0xff]  ;;  %v226_v16 = vld [vmem:[%s2080_s21 + $0x68] sm:$0xff]  ;;  %v227_v17 = vld [vmem:[%s2080_s21 + $0x70] sm:$0xff]  ;;  %s1851_s18 = scalar_lea.vmem %s2237_s30, 1536  ;;  %s1941_s19 = smov [#allocation5]  }
  0x40   : > { %v228_v18 = vld [vmem:[%s2080_s21 + $0x78] sm:$0xff]  ;;  %v229_v19 = vld [vmem:[%s2080_s21 + $0x80] sm:$0xff]  ;;  %v230_v20 = vld [vmem:[%s2080_s21 + $0x88] sm:$0xff]  ;;  %p1852_p8 = scmp.ne.s32.totalorder %s2237_s30, %s1851_s18 }
  0x41   : > { %1588 = vmatmul.mubr.msk.f32.vlgmr.msra.gmra.mrb[0].mxu0 %vm237_vm0, %v214_v4  ;;  %v231_v21 = vld [vmem:[%s2080_s21 + $0x90] sm:$0xff]  ;;  %v232_v22 = vld [vmem:[%s2080_s21 + $0x98] sm:$0xff]  ;;  %v233_v23 = vld [vmem:[%s2080_s21 + $0xa0] sm:$0xff] }
  0x42   : > { %1590 = vmatprep.mubr.msk.f32.mxu0 %vm237_vm0, %v215_v5  ;;  %v234_v24 = vld [vmem:[%s2080_s21 + $0xa8] sm:$0xff]  ;;  %v235_v25 = vld [vmem:[%s2080_s21 + $0xb0] sm:$0xff]  ;;  %v236_v26 = vld [vmem:[%s2080_s21 + $0xb8] sm:$0xff]  ;;  %p1853_p11 = pnand %p1852_p8, %p2299_p9  ;;  %s1855_s21 = sshll.u32 %s1941_s19, 4  ;;  %s1856_s21 = int_to_ptr.vmem [resolvable:$false] %s1855_s21 }
  0x43   : > { %v2146_v33 = vld [vmem:[%s2288_s0] sm:$0xff]  ;;  %s1857_s4 = scalar_lea.vmem %s1856_s21, 3072  ;;  %p1858_p5 = scmp.lt.s32.totalorder %s2237_s30, %s1856_s21 }
  0x44   : > { %p1854_p0 = pneg %p1853_p11  ;;  %p1859_p13 = scmp.lt.s32.totalorder %s1857_s4, %s1851_s18 }
  0x45   : > { %1591 = vmatmul.mubr.msk.f32.gmra.mrb[2].mxu0 %vm237_vm0, %v216_v6 }
  0x46   : > { %1593 = vmatprep.mubr.msk.f32.mxu0 %vm237_vm0, %v217_v7  ;;  %p1860_p2 = por %p1859_p13, %p1858_p5 }
  0x48   : > { %p1861_p4 = pnand %p1860_p2, %p1854_p0 }
  0x49   : > { %1594 = vmatmul.mubr.msk.f32.gmra.mrb[4].mxu0 %vm237_vm0, %v218_v8 }
  0x4a   : > { %1596 = vmatprep.mubr.msk.f32.mxu0 %vm237_vm0, %v219_v9 }
  0x4d   : > { %1597 = vmatmul.mubr.msk.f32.gmra.mrb[6].mxu0 %vm237_vm0, %v220_v10 }
  0x4e   : > { %1599 = vmatprep.mubr.msk.f32.mxu0 %vm237_vm0, %v221_v11 }
  0x51   : > { %1600 = vmatmul.mubr.msk.f32.gmra.mrb[8].mxu0 %vm237_vm0, %v222_v12 }
  0x52   : > { %1602 = vmatprep.mubr.msk.f32.mxu0 %vm237_vm0, %v223_v13 }
  0x55   : > { %1603 = vmatmul.mubr.msk.f32.gmra.mrb[10].mxu0 %vm237_vm0, %v224_v14 }
  0x56   : > { %1605 = vmatprep.mubr.msk.f32.mxu0 %vm237_vm0, %v225_v15 }
  0x59   : > { %1606 = vmatmul.mubr.msk.f32.gmra.mrb[12].mxu0 %vm237_vm0, %v226_v16 }
  0x5a   : > { %1608 = vmatprep.mubr.msk.f32.mxu0 %vm237_vm0, %v227_v17 }
  0x5d   : > { %1609 = vmatmul.mubr.msk.f32.gmra.mrb[14].mxu0 %vm237_vm0, %v228_v18 }
  0x5e   : > { %1611 = vmatprep.mubr.msk.f32.mxu0 %vm237_vm0, %v229_v19 }
  0x61   : > { %1612 = vmatmul.mubr.msk.f32.gmra.mrb[16].mxu0 %vm237_vm0, %v230_v20 }
  0x62   : > { %1614 = vmatprep.mubr.msk.f32.mxu0 %vm237_vm0, %v231_v21 }
  0x65   : > { %1615 = vmatmul.mubr.msk.f32.gmra.mrb[18].mxu0 %vm237_vm0, %v232_v22 }
  0x66   : > { %1617 = vmatprep.mubr.msk.f32.mxu0 %vm237_vm0, %v233_v23 }
  0x69   : > { %1618 = vmatmul.mubr.msk.f32.gmra.mrb[20].mxu0 %vm237_vm0, %v234_v24 }
  0x6a   : > { %1620 = vmatprep.mubr.msk.f32.mxu0 %vm237_vm0, %v235_v25 }
  0x6d   : > { %1621 = vmatmul.mubr.msk.f32.gmra.mrb[22].mxu0 %vm237_vm0, %v236_v26 }
 0x114   : > { %v1589_v29 = vpop.f32.mrb[0].mxu0 }
 0x115   : > { %v376_v30 = vpop.f32.mrb[1].mxu0 }
 0x116   : > { %v1712_v31 = vpack.c.bf16 %v1589_v29, %v376_v30 }
 0x118   : > { %v1592_v32 = vpop.f32.mrb[2].mxu0  ;;  %1713 = vmatpush3.bf16.msra.mxu1 %v1712_v31 }
 0x119   : > { %v386_v34 = vpop.f32.mrb[3].mxu0  ;;  %1714 = vmatprep.subr.bf16.mxu1 %v1938_v27 }
 0x11a   : > { %v1715_v35 = vpack.c.bf16 %v1592_v32, %v386_v34 }
 0x11b   : > { %1628 = vmatmul.mubr.msk.f32.vlgmr.msra.gmra.mrb[0].mxu1 %vm237_vm0, %v2146_v33 }
 0x11c   : > { %v1595_v36 = vpop.f32.mrb[4].mxu0  ;;  %1716 = vmatpush3.bf16.msra.mxu1 %v1715_v35  ;;  %1634 = vmatprep.mubr.msk.f32.mxu1 %vm1939_vm1, %v1940_v28 }
 0x11d   : > { %v396_v37 = vpop.f32.mrb[5].mxu0  ;;  %1717 = vmatprep.subr.bf16.mxu1 %v1938_v27 }
 0x11e   : > { %v1718_v38 = vpack.c.bf16 %v1595_v36, %v396_v37 }
 0x11f   : > { %1635 = vmatmul.mubr.msk.f32.vlgmr.msra.gmra.mrb[2].mxu1 %vm237_vm0, %v2146_v33 }
 0x120   : > { %v1598_v39 = vpop.f32.mrb[6].mxu0  ;;  %1719 = vmatpush3.bf16.msra.mxu1 %v1718_v38  ;;  %1641 = vmatprep.mubr.msk.f32.mxu1 %vm1939_vm1, %v1940_v28 }
 0x121   : > { %v406_v40 = vpop.f32.mrb[7].mxu0  ;;  %1720 = vmatprep.subr.bf16.mxu1 %v1938_v27 }
 0x122   : > { %v1721_v41 = vpack.c.bf16 %v1598_v39, %v406_v40 }
 0x123   : > { %1642 = vmatmul.mubr.msk.f32.vlgmr.msra.gmra.mrb[4].mxu1 %vm237_vm0, %v2146_v33 }
 0x124   : > { %v1601_v42 = vpop.f32.mrb[8].mxu0  ;;  %1722 = vmatpush3.bf16.msra.mxu1 %v1721_v41  ;;  %1648 = vmatprep.mubr.msk.f32.mxu1 %vm1939_vm1, %v1940_v28 }
 0x125   : > { %v416_v43 = vpop.f32.mrb[9].mxu0  ;;  %1723 = vmatprep.subr.bf16.mxu1 %v1938_v27 }
 0x126   : > { %v1724_v44 = vpack.c.bf16 %v1601_v42, %v416_v43 }
 0x127   : > { %1649 = vmatmul.mubr.msk.f32.vlgmr.msra.gmra.mrb[6].mxu1 %vm237_vm0, %v2146_v33 }
 0x128   : > { %v1604_v45 = vpop.f32.mrb[10].mxu0  ;;  %1725 = vmatpush3.bf16.msra.mxu1 %v1724_v44  ;;  %1655 = vmatprep.mubr.msk.f32.mxu1 %vm1939_vm1, %v1940_v28 }
 0x129   : > { %v426_v46 = vpop.f32.mrb[11].mxu0  ;;  %1726 = vmatprep.subr.bf16.mxu1 %v1938_v27 }
 0x12a   : > { %v1727_v47 = vpack.c.bf16 %v1604_v45, %v426_v46 }
 0x12b   : > { %1656 = vmatmul.mubr.msk.f32.vlgmr.msra.gmra.mrb[8].mxu1 %vm237_vm0, %v2146_v33 }
 0x12c   : > { %v1607_v48 = vpop.f32.mrb[12].mxu0  ;;  %1728 = vmatpush3.bf16.msra.mxu1 %v1727_v47  ;;  %1662 = vmatprep.mubr.msk.f32.mxu1 %vm1939_vm1, %v1940_v28 }
 0x12d   : > { %v436_v49 = vpop.f32.mrb[13].mxu0  ;;  %1729 = vmatprep.subr.bf16.mxu1 %v1938_v27 }
 0x12e   : > { %v1730_v50 = vpack.c.bf16 %v1607_v48, %v436_v49 }
 0x12f   : > { %1663 = vmatmul.mubr.msk.f32.vlgmr.msra.gmra.mrb[10].mxu1 %vm237_vm0, %v2146_v33 }
 0x130   : > { %v1610_v51 = vpop.f32.mrb[14].mxu0  ;;  %1731 = vmatpush3.bf16.msra.mxu1 %v1730_v50  ;;  %1669 = vmatprep.mubr.msk.f32.mxu1 %vm1939_vm1, %v1940_v28 }
 0x131   : > { %v446_v52 = vpop.f32.mrb[15].mxu0  ;;  %1732 = vmatprep.subr.bf16.mxu1 %v1938_v27 }
 0x132   : > { %v1733_v53 = vpack.c.bf16 %v1610_v51, %v446_v52 }
 0x133   : > { %1670 = vmatmul.mubr.msk.f32.vlgmr.msra.gmra.mrb[12].mxu1 %vm237_vm0, %v2146_v33 }
 0x134   : > { %v1613_v54 = vpop.f32.mrb[16].mxu0  ;;  %1734 = vmatpush3.bf16.msra.mxu1 %v1733_v53  ;;  %1676 = vmatprep.mubr.msk.f32.mxu1 %vm1939_vm1, %v1940_v28 }
 0x135   : > { %v456_v55 = vpop.f32.mrb[17].mxu0  ;;  %1735 = vmatprep.subr.bf16.mxu1 %v1938_v27 }
 0x136   : > { %v1736_v56 = vpack.c.bf16 %v1613_v54, %v456_v55 }
 0x137   : > { %1677 = vmatmul.mubr.msk.f32.vlgmr.msra.gmra.mrb[14].mxu1 %vm237_vm0, %v2146_v33 }
 0x138   : > { %v1616_v57 = vpop.f32.mrb[18].mxu0  ;;  %1737 = vmatpush3.bf16.msra.mxu1 %v1736_v56  ;;  %1683 = vmatprep.mubr.msk.f32.mxu1 %vm1939_vm1, %v1940_v28 }
 0x139   : > { %v466_v58 = vpop.f32.mrb[19].mxu0  ;;  %1738 = vmatprep.subr.bf16.mxu1 %v1938_v27 }
 0x13a   : > { %v1739_v59 = vpack.c.bf16 %v1616_v57, %v466_v58 }
 0x13b   : > { %1684 = vmatmul.mubr.msk.f32.vlgmr.msra.gmra.mrb[16].mxu1 %vm237_vm0, %v2146_v33 }
 0x13c   : > { %v1619_v60 = vpop.f32.mrb[20].mxu0  ;;  %1740 = vmatpush3.bf16.msra.mxu1 %v1739_v59  ;;  %1690 = vmatprep.mubr.msk.f32.mxu1 %vm1939_vm1, %v1940_v28 }
 0x13d   : > { %v476_v61 = vpop.f32.mrb[21].mxu0  ;;  %1741 = vmatprep.subr.bf16.mxu1 %v1938_v27 }
 0x13e   : > { %v1742_v62 = vpack.c.bf16 %v1619_v60, %v476_v61 }
 0x13f   : > { %1691 = vmatmul.mubr.msk.f32.vlgmr.msra.gmra.mrb[18].mxu1 %vm237_vm0, %v2146_v33 }
 0x140   : > { %v1622_v63 = vpop.f32.mrb[22].mxu0  ;;  %1743 = vmatpush3.bf16.msra.mxu1 %v1742_v62  ;;  %1697 = vmatprep.mubr.msk.f32.mxu1 %vm1939_vm1, %v1940_v28 }
 0x141   : > { %v486_v0 = vpop.f32.mrb[23].mxu0  ;;  %1744 = vmatprep.subr.bf16.mxu1 %v1938_v27 }
 0x142   : > { %v1745_v1 = vpack.c.bf16 %v1622_v63, %v486_v0 }
 0x143   : > { %1698 = vmatmul.mubr.msk.f32.vlgmr.msra.gmra.mrb[20].mxu1 %vm237_vm0, %v2146_v33 }
 0x144   : > { %1746 = vmatpush3.bf16.msra.mxu1 %v1745_v1  ;;  %1704 = vmatprep.mubr.msk.f32.mxu1 %vm1939_vm1, %v1940_v28 }
 0x147   : > { %1705 = vmatmul.mubr.msk.f32.vlgmr.msra.gmra.mrb[22].mxu1 %vm237_vm0, %v2146_v33 }
 0x1ee   : > { %v564_v2 = vpop.f32.mrb[0].mxu1 }
 0x1ef   : > { %569 = vst.msk [vmem:[%s2206_s28] sm:$0xff] %vm568_vm2, %v564_v2  ;;  %v1629_v3 = vpop.f32.mrb[1].mxu1 }
 0x1f2   : > { %v636_v4 = vpop.f32.mrb[2].mxu1 }
 0x1f3   : > { %1497 = vst.msk [vmem:[%s2206_s28 + $0x18] sm:$0xff] %vm568_vm2, %v636_v4  ;;  %v1636_v5 = vpop.f32.mrb[3].mxu1 }
 0x1f6   : > { %v708_v6 = vpop.f32.mrb[4].mxu1 }
 0x1f7   : > { %1499 = vst.msk [vmem:[%s2206_s28 + $0x30] sm:$0xff] %vm568_vm2, %v708_v6  ;;  %v1643_v7 = vpop.f32.mrb[5].mxu1 }
 0x1fa   : > { %v780_v8 = vpop.f32.mrb[6].mxu1 }
 0x1fb   : > { %1501 = vst.msk [vmem:[%s2206_s28 + $0x48] sm:$0xff] %vm568_vm2, %v780_v8  ;;  %v1650_v9 = vpop.f32.mrb[7].mxu1 }
 0x1fe   : > { %v852_v10 = vpop.f32.mrb[8].mxu1 }
 0x1ff   : > { %1503 = vst.msk [vmem:[%s2206_s28 + $0x8] sm:$0xff] %vm568_vm2, %v852_v10  ;;  %v1657_v11 = vpop.f32.mrb[9].mxu1 }
 0x202   : > { %v924_v12 = vpop.f32.mrb[10].mxu1 }
 0x203   : > { %1505 = vst.msk [vmem:[%s2206_s28 + $0x20] sm:$0xff] %vm568_vm2, %v924_v12  ;;  %v1664_v13 = vpop.f32.mrb[11].mxu1 }
 0x206   : > { %v996_v14 = vpop.f32.mrb[12].mxu1 }
 0x207   : > { %1507 = vst.msk [vmem:[%s2206_s28 + $0x38] sm:$0xff] %vm568_vm2, %v996_v14  ;;  %v1671_v15 = vpop.f32.mrb[13].mxu1 }
 0x20a   : > { %v1068_v16 = vpop.f32.mrb[14].mxu1 }
 0x20b   : > { %1509 = vst.msk [vmem:[%s2206_s28 + $0x50] sm:$0xff] %vm568_vm2, %v1068_v16  ;;  %v1678_v17 = vpop.f32.mrb[15].mxu1 }
 0x20e   : > { %v1140_v18 = vpop.f32.mrb[16].mxu1 }
 0x20f   : > { %1511 = vst.msk [vmem:[%s2206_s28 + $0x10] sm:$0xff] %vm568_vm2, %v1140_v18  ;;  %v1685_v19 = vpop.f32.mrb[17].mxu1 }
 0x212   : > { %v1212_v20 = vpop.f32.mrb[18].mxu1 }
 0x213   : > { %1513 = vst.msk [vmem:[%s2206_s28 + $0x28] sm:$0xff] %vm568_vm2, %v1212_v20  ;;  %v1692_v21 = vpop.f32.mrb[19].mxu1 }
 0x216   : > { %v1284_v22 = vpop.f32.mrb[20].mxu1 }
 0x217   : > { %1515 = vst.msk [vmem:[%s2206_s28 + $0x40] sm:$0xff] %vm568_vm2, %v1284_v22  ;;  %v1699_v23 = vpop.f32.mrb[21].mxu1 }
 0x21a   : > { %v1356_v24 = vpop.f32.mrb[22].mxu1 }
 0x21b   : > { %1517 = vst.msk [vmem:[%s2206_s28 + $0x58] sm:$0xff] %vm568_vm2, %v1356_v24  ;;  %v1706_v25 = vpop.f32.mrb[23].mxu1 }
 0x21c   : > { %1864 = shalt.err (!%p1861_p4)
}
 0x21d   : > { %s1865_s7 = scalar_lea.hbm %s2235_s8, 1536  ;;  %s1869_s24 = scalar_lea.hbm %s2291_s3, 3072 }
 0x21e   : > { %p1866_p6 = scmp.ne.s32.totalorder %s2235_s8, %s1865_s7  ;;  %p1870_p12 = scmp.lt.u32.totalorder %s2235_s8, %s2291_s3 }
 0x21f   : > { %p1871_p1 = scmp.lt.u32.totalorder %s1869_s24, %s1865_s7  ;;  %p1873_p8 = scmp.lt.u32.totalorder %s1865_s7, %s2235_s8 }
 0x220   : > { %p1867_p7 = pnand %p1866_p6, %p2299_p9 }
 0x221   : > { %p1872_p3 = por %p1871_p1, %p1870_p12 }
 0x222   : > { %p1868_p10 = pneg %p1867_p7 }
 0x223   : > { %p1874_p11 = por %p1873_p8, %p1872_p3 }
 0x225   : > { %p1875_p0 = pnand %p1874_p11, %p1868_p10 }
 0x227   : > { %1878 = shalt.err (!%p1875_p0)
}
 0x228   : > { %s1942_s28 = smov 128   ;;  %s1943_s29 = smov 8  }
 0x229   : > { %1754 = dma.vmem_to_hbm [thread:$0]  (%p2299_p9), %s2237_s30, 1536, %s2235_s8, %s1363_s15, %s1942_s28, %s1942_s28, %s1943_s29  }
 0x22a PF: > { %s1393_s5 = sand.u32 1, %s1913_s12   ;;  %p2300_p5 = scmp.ne.s32.totalorder %s2296_s27, 0 }
 0x22b   : > { %p2301_p13 = scmp.ge.s32.totalorder %s1933_s17, 2  ;;  %s1394_s6 = scalar_lea.sflag [#allocation4], %s1393_s5 }
 0x22d   : > { %p1761_p2 = pnand %p2301_p13, %p2300_p5 }
 0x22f   : > { %1908 = dma.done.wait (!%p1761_p2), %s1394_s6, 1536  }
 0x230   : > { %1910 = vsyncadd (!%p1761_p2), %s1394_s6, 4294965760  ;;  %s19_s17 = sadd.s32 1, %s1933_s17   ;;  %s2302_s12 = smov %s1917_s13 }
 0x231   : > { %p16_p4 = scmp.ge.s32.totalorder %s19_s17, 4   ;;  %s2303_s13 = smov %s1921_s14 }
 0x232   : > { %s2304_s14 = smov %s2020_s26  ;;  %s2305_s15 = smov %s1929_s16 }
 0x233   : > { %s2306_s16 = smov %s2308_s20  ;;  %18 = sbr.rel (!%p16_p4) target bundleno = 6 (0x6), region = 88 }
 0x23a   :  { %1399 = vsyncpa [#allocation3], 1 }
 0x23b   :  { %1401 = vsyncpa [#allocation3 + $0x1], 1 }
 0x23c   :  { %1402 = vsyncpa [#allocation4], 1 }
 0x23d   :  { %1404 = vsyncpa [#allocation4 + $0x1], 1 }

</bundles_post_ra>
